<compile_context>
chip_gen: v7x
topology: tpu7x:2x2x1
jax: 0.10.0
libtpu: 0.0.40
codegen_flags: <defaults>
</compile_context>

<pallas_src>
import functools

import jax
import jax.numpy as jnp
from jax import lax
from jax.experimental import pallas as pl
from jax.experimental.pallas import tpu as pltpu


def _insert_zeros_kernel(e_ref, x_ref, o_ref, *, up_x, up_y, gain):
    """e_ref: (W, W*up_x) constant 0/1 column-dilation matrix.
    x_ref:  (TR, W)        input rows.
    o_ref:  (TR, up_y*W*up_x) output rows (data in first W*up_x lanes)."""
    tr, w = x_ref.shape
    w2 = w * up_x
    ow = o_ref.shape[-1]

    x = x_ref[...]
    if up_x == 1:
        y = x.astype(jnp.float32)
    else:
        # Column interleave: y[r, j*up_x] = x[r, j], other lanes exact 0.
        # HIGHEST precision keeps f32 inputs bit-exact through the MXU.
        y = jnp.dot(x, e_ref[...],
                    precision=lax.Precision.HIGHEST,
                    preferred_element_type=jnp.float32)

    if gain != 1.0:
        y = y * jnp.float32(gain)
    y = y.astype(o_ref.dtype)

    if up_y == 1:
        o_ref[...] = y
    else:
        # Row interleave folded into lanes: dense, lane-contiguous stores.
        o_ref[:, :w2] = y
        o_ref[:, w2:] = jnp.zeros((tr, ow - w2), o_ref.dtype)


def _vmem_sizes():
    """Generation-aware (vmem_limit_bytes, per-block VMEM budget)."""
    cap = 64 * 1024 * 1024  # conservative fallback: v7x per-TensorCore VMEM
    try:
        info = pltpu.get_tpu_info()
        cap = int(getattr(info, "vmem_capacity_bytes", cap))
    except Exception:
        pass
    limit = min(cap * 3 // 4, 96 * 1024 * 1024)   # ~48 MiB v7x, 96 MiB v5e/v6e
    limit = max(limit, 32 * 1024 * 1024)
    budget = limit // 3
    return limit, budget


def _divisors(n):
    ds = set()
    i = 1
    while i * i <= n:
        if n % i == 0:
            ds.add(i)
            ds.add(n // i)
        i += 1
    return sorted(ds)


def _pick_rows_per_block(total_rows, row_bytes, fixed_bytes, budget,
                         min_steps=4):
    """Largest row-block that fits VMEM, keeping >= min_steps grid steps
    (pipelining + megacore sharding).  Blocks respect the sublane rule:
    tr % 8 == 0 or tr == total_rows."""
    cands = [d for d in _divisors(total_rows)
             if d == total_rows or d % 8 == 0]
    best = None
    for d in cands:  # ascending
        fits = fixed_bytes + d * row_bytes <= budget
        enough_steps = (total_rows // d) >= min_steps
        if fits and enough_steps:
            best = d
    if best is None:
        fitting = [d for d in cands if fixed_bytes + d * row_bytes <= budget]
        best = max(fitting) if fitting else min(cands)
    return best


def insert_zeros(x, up_x, up_y, gain=1.0):
    """Pallas implementation of InsertZeros.forward. x: [B, C, H, W] (NCHW)."""
    b, c, h, w = x.shape
    total_rows = b * c * h
    w2 = w * up_x
    ow = up_y * w2

    # Flat row view of the input; free (contiguous) reshape in HBM.
    x2 = x.reshape(total_rows, w)

    # Constant 0/1 column-dilation matrix: e[j, j*up_x] = 1.  Gain is applied
    # on the VPU in f32, so it is never quantized into the matrix.
    src = lax.broadcasted_iota(jnp.int32, (w, w2), 0)
    dst = lax.broadcasted_iota(jnp.int32, (w, w2), 1)
    e = (dst == src * up_x).astype(x.dtype)

    # Block sizing: double-buffered in/out rows + f32 temporaries + matrix.
    vmem_limit, budget = _vmem_sizes()
    esize = x.dtype.itemsize
    row_bytes = (2 * w + 3 * ow) * esize + 2 * w2 * 4
    fixed_bytes = 2 * w * w2 * esize
    tr = _pick_rows_per_block(total_rows, row_bytes, fixed_bytes, budget)

    kernel = functools.partial(
        _insert_zeros_kernel, up_x=up_x, up_y=up_y, gain=float(gain))

    out2 = pl.pallas_call(
        kernel,
        out_shape=jax.ShapeDtypeStruct((total_rows, ow), x.dtype),
        grid=(total_rows // tr,),
        in_specs=[
            pl.BlockSpec((w, w2), lambda n: (0, 0)),   # constant, resident
            pl.BlockSpec((tr, w), lambda n: (n, 0)),   # TR input rows / step
        ],
        out_specs=pl.BlockSpec((tr, ow), lambda n: (n, 0)),
        compiler_params=pltpu.CompilerParams(
            dimension_semantics=("parallel",),
            vmem_limit_bytes=vmem_limit),
    )(e, x2)

    # Exact PyTorch semantics: flat reinterpretation as [H*up_x, W*up_y].
    return out2.reshape(b, c, h * up_x, w * up_y)


def _insert_zeros_reference(x, up_x, up_y, gain=1.0):
    """Pure-JAX transcription of the PyTorch forward (for verification)."""
    b, c, h, w = x.shape
    x6 = x.reshape(b, c, h, 1, w, 1)
    x6 = jnp.pad(
        x6,
        ((0, 0), (0, 0), (0, 0), (0, up_y - 1), (0, 0), (0, up_x - 1)))
    out = x6.reshape(b, c, h * up_x, w * up_y)
    return out * gain


if __name__ == "__main__":
    # Module config (deterministic; the module has no learned parameters).
    up_x, up_y, gain = 2, 3, 1.5

    key = jax.random.PRNGKey(0)
    x = jax.random.normal(key, (2, 4, 16, 16), dtype=jnp.float32)  # [B,C,H,W]

    out = insert_zeros(x, up_x, up_y, gain)
    out = jax.block_until_ready(out)

    ref = _insert_zeros_reference(x, up_x, up_y, gain)
    assert out.shape == ref.shape, (out.shape, ref.shape)
    assert out.dtype == ref.dtype, (out.dtype, ref.dtype)
    assert jnp.allclose(out, ref, atol=1e-5, rtol=1e-5), "mismatch vs reference"

    print("KERNEL_OK")
</pallas_src>

<mosaic_0001>
module attributes {stable_mosaic.version = 11 : i64} {
  func.func @_insert_zeros_kernel(%arg0: i32, %arg1: memref<16x32xf32, #tpu.memory_space<vmem>>, %arg2: memref<32x16xf32, #tpu.memory_space<vmem>>, %arg3: memref<32x96xf32, #tpu.memory_space<vmem>>) attributes {dimension_semantics = [#tpu.dimension_semantics<parallel>], iteration_bounds = array<i64: 4>, scalar_prefetch = 0 : i64, scratch_operands = 0 : i64, tpu.core_type = #tpu.core_type<tc>, window_params = [{pipeline_mode = #tpu.pipeline_mode<synchronous>, transform_indices = @transform_0, window_bounds = array<i64: 16, 32>}, {transform_indices = @transform_1, window_bounds = array<i64: 32, 16>}, {transform_indices = @transform_2, window_bounds = array<i64: 32, 96>}]} {
    %c0 = arith.constant 0 : index
    %c0_0 = arith.constant 0 : index
    %0 = vector.load %arg2[%c0, %c0_0] : memref<32x16xf32, #tpu.memory_space<vmem>>, vector<32x16xf32>
    %c0_1 = arith.constant 0 : index
    %c0_2 = arith.constant 0 : index
    %1 = vector.load %arg1[%c0_1, %c0_2] : memref<16x32xf32, #tpu.memory_space<vmem>>, vector<16x32xf32>
    %cst = arith.constant dense<0.000000e+00> : vector<32x32xf32>
    %2 = tpu.matmul %0, %1, %cst {dimension_numbers = #tpu.dot_dimension_numbers<[1], [0], [0], [1], [0, 0, 1, 1], [], []>, precision = #tpu.contract_precision<fp32>} : vector<32x16xf32>, vector<16x32xf32>, vector<32x32xf32> -> vector<32x32xf32>
    %cst_3 = arith.constant 1.500000e+00 : f32
    %3 = vector.broadcast %cst_3 : f32 to vector<32x32xf32>
    %4 = arith.mulf %2, %3 : vector<32x32xf32>
    %c0_4 = arith.constant 0 : index
    %c0_5 = arith.constant 0 : index
    %5 = vector.load %arg3[%c0_4, %c0_5] : memref<32x96xf32, #tpu.memory_space<vmem>>, vector<32x32xf32>
    tpu.vector_store %arg3[%c0_4, %c0_5], %4 {strides = array<i32>} : memref<32x96xf32, #tpu.memory_space<vmem>>, vector<32x32xf32>,
    %cst_6 = arith.constant 0.000000e+00 : f32
    %6 = vector.broadcast %cst_6 : f32 to vector<32x64xf32>
    %c0_7 = arith.constant 0 : index
    %c32 = arith.constant 32 : index
    %7 = vector.load %arg3[%c0_7, %c32] : memref<32x96xf32, #tpu.memory_space<vmem>>, vector<32x64xf32>
    tpu.vector_store %arg3[%c0_7, %c32], %6 {strides = array<i32>} : memref<32x96xf32, #tpu.memory_space<vmem>>, vector<32x64xf32>,
    return
  }
  func.func @transform_0(%arg0: i32) -> (i32, i32) {
    %c0_i32 = arith.constant 0 : i32
    %c0_i32_0 = arith.constant 0 : i32
    %c0_i32_1 = arith.constant 0 : i32
    return %c0_i32, %c0_i32_0 : i32, i32
  }
  func.func @transform_1(%arg0: i32) -> (i32, i32) {
    %c0_i32 = arith.constant 0 : i32
    %c0_i32_0 = arith.constant 0 : i32
    return %arg0, %c0_i32 : i32, i32
  }
  func.func @transform_2(%arg0: i32) -> (i32, i32) {
    %c0_i32 = arith.constant 0 : i32
    %c0_i32_0 = arith.constant 0 : i32
    return %arg0, %c0_i32 : i32, i32
  }
}

</mosaic_0001>

<bundles_post_ra>
// kernel: tpu_custom_call.1
= control target key start
LH: loop header
LB: loop body
LE: loop exit
PB: predicated region body
PF: predicated region fallthrough
CT: control target
= control target key end

     0   :  { %s1008_s9 = smov 0   ;;  %s1058_s0 = inlined_call_operand.vmem [shape: f32[16,32], index: 0, kind: input, shape index: {}]   ;;  %s1059_s1 = inlined_call_operand.vmem [shape: f32[128,16], index: 1, kind: input, shape index: {}]   ;;  %s1060_s2 = inlined_call_operand.vmem [shape: f32[128,96], index: 2, kind: output, shape index: {}]  }
   0x1 LB: > { %s824_s10 = sadd.s32 4294967295, %s990_s9   ;;  %p828_p0 = scmp.ge.s32.totalorder %s990_s9, 1  ;;  %s990_s9 = sphi %s1008_s9, %s12_s9  }
   0x2   : > { %p113_p1 = scmp.lt.s32.totalorder %s990_s9, 5 }
   0x4   : > { %p114_p2 = pnand %p828_p0, %p113_p1 }
   0x5   : > { %v151_v0 = vld [vmem:[%s1058_s0] sm:$0xff] (!%p114_p2)  ;;  %v152_v1 = vld [vmem:[%s1058_s0 + $0x8] sm:$0xff] (!%p114_p2)  ;;  %s829_s15 = sshll.u32 (!%p114_p2), %s824_s10, 2  ;;  %vm153_vm0 = vcmask (!%p114_p2), 130048   ;;  %vm758_vm1 = vcmask (!%p114_p2), 261120   ;;  %vm763_vm2 = vcmask (!%p114_p2), 785664  }
   0x6   : > { %117 = sbr.rel (%p114_p2) target bundleno = 269 (0x10d), region = 28  ;;  %v167_v2 = vand.u32 (!%p114_p2), 4294901760, %v151_v0  ;;  %v170_v3 = vand.u32 (!%p114_p2), 4294901760, %v152_v1  ;;  %p136_p3 = scmp.lt.s32.totalorder (!%p114_p2), %s829_s15, 15  ;;  %v992_v57 = vmov (!%p114_p2), 0.0  }
   0x8   : > { %v1022_v4 = vpack.c.bf16 (!%p114_p2), %v170_v3, %v167_v2  ;;  %v275_v5 = vsub.f32 (!%p114_p2), %v151_v0, %v167_v2  ;;  %v282_v6 = vsub.f32 (!%p114_p2), %v152_v1, %v170_v3 }
   0xa   : > { %944 = vmatprep.subr.bf16.mxu0 (!%p114_p2), %v1022_v4  ;;  %932 = vmatprep.subr.bf16.mxu1 (!%p114_p2), %v1022_v4  ;;  %v276_v7 = vand.u32 (!%p114_p2), 4294901760, %v275_v5  ;;  %v283_v8 = vand.u32 (!%p114_p2), 4294901760, %v282_v6  ;;  %v939_v42 = vpack.c.bf16 (!%p114_p2), %v282_v6, %v275_v5 }
   0xb   : > { %946 = vmatpush3.bf16.msra.mxu0 (!%p114_p2), %v1022_v4  ;;  %934 = vmatpush3.bf16.msra.mxu1 (!%p114_p2), %v1022_v4 }
   0xc   : > { %v277_v11 = vsub.f32 (!%p114_p2), %v275_v5, %v276_v7  ;;  %v284_v12 = vsub.f32 (!%p114_p2), %v282_v6, %v283_v8  ;;  %v947_v14 = vpack.c.bf16 (!%p114_p2), %v283_v8, %v276_v7 }
   0xd   : > { %s1062_s15 = smov (!%p136_p3, %s829_s15), 15 }
   0xe   : > { %s830_s16 = sshll.u32 %s1062_s15, 3  ;;  %v278_v21 = vand.u32 4294901760, %v277_v11  ;;  %v285_v22 = vand.u32 4294901760, %v284_v12  ;;  %948 = vmatprep.subr.bf16.mxu0 %v947_v14 }
   0xf   : > { %s139_s19 = scalar_lea.vmem %s1059_s1, %s830_s16  ;;  %s145_s22 = scalar_lea.vmem %s1060_s2, %s830_s16 }
  0x10   : > { %v147_v9 = vld [vmem:[%s139_s19] sm:$0xff]  ;;  %v148_v10 = vld [vmem:[%s139_s19 + $0x8] sm:$0xff]  ;;  %v149_v13 = vld [vmem:[%s139_s19 + $0x10] sm:$0xff]  ;;  %v935_v27 = vpack.c.bf16 %v285_v22, %v278_v21 }
  0x11   : > { %v155_v15 = vsel %vm153_vm0, %v147_v9, 0  ;;  %v158_v16 = vsel %vm153_vm0, %v148_v10, 0  ;;  %v161_v17 = vsel %vm153_vm0, %v149_v13, 0  ;;  %v150_v18 = vld [vmem:[%s139_s19 + $0x18] sm:$0xff] }
  0x12   : > { %v233_v19 = vand.u32 4294901760, %v155_v15  ;;  %v243_v20 = vand.u32 4294901760, %v158_v16  ;;  %v253_v23 = vand.u32 4294901760, %v161_v17  ;;  %v164_v24 = vsel %vm153_vm0, %v150_v18, 0  ;;  %936 = vmatprep.subr.bf16.mxu1 %v935_v27 }
  0x13   : > { %v263_v28 = vand.u32 4294901760, %v164_v24 }
  0x14   : > { %v234_v25 = vsub.f32 %v155_v15, %v233_v19  ;;  %v244_v26 = vsub.f32 %v158_v16, %v243_v20  ;;  %v254_v29 = vsub.f32 %v161_v17, %v253_v23 }
  0x15   : > { %v264_v32 = vsub.f32 %v164_v24, %v263_v28 }
  0x16   : > { %v235_v30 = vand.u32 4294901760, %v234_v25  ;;  %v245_v31 = vand.u32 4294901760, %v244_v26  ;;  %v255_v33 = vand.u32 4294901760, %v254_v29 }
  0x17   : > { %v265_v36 = vand.u32 4294901760, %v264_v32 }
  0x18   : > { %905 = vmatprep.mubr.f32.mxu0 %v235_v30  ;;  %v236_v34 = vsub.f32 %v234_v25, %v235_v30  ;;  %v246_v35 = vsub.f32 %v244_v26, %v245_v31  ;;  %v256_v37 = vsub.f32 %v254_v29, %v255_v33 }
  0x19   : > { %906 = vmatmul.mubr.f32.vlgmr.msra.gmra.mrb[0].mxu0 %v245_v31  ;;  %v266_v40 = vsub.f32 %v264_v32, %v265_v36 }
  0x1a   : > { %v237_v38 = vand.u32 4294901760, %v236_v34  ;;  %908 = vmatprep.mubr.f32.mxu0 %v255_v33  ;;  %v247_v39 = vand.u32 4294901760, %v246_v35  ;;  %950 = vmatpush3.bf16.msra.mxu0 %v947_v14  ;;  %v257_v41 = vand.u32 4294901760, %v256_v37 }
  0x1b   : > { %952 = vmatprep.subr.bf16.mxu0 %v1022_v4  ;;  %v267_v43 = vand.u32 4294901760, %v266_v40 }
  0x1c   : > { %875 = vmatprep.mubr.f32.mxu1 %v237_v38 }
  0x1d   : > { %876 = vmatmul.mubr.f32.vlgmr.msra.gmra.mrb[0].mxu1 %v247_v39  ;;  %909 = vmatmul.mubr.f32.gmra.mrb[2].mxu0 %v265_v36 }
  0x1e   : > { %938 = vmatpush3.bf16.msra.mxu1 %v935_v27  ;;  %878 = vmatprep.mubr.f32.mxu1 %v257_v41 }
  0x1f   : > { %915 = vmatprep.mubr.f32.mxu0 %v233_v19  ;;  %940 = vmatprep.subr.bf16.mxu1 %v939_v42 }
  0x21   : > { %879 = vmatmul.mubr.f32.gmra.mrb[2].mxu1 %v267_v43  ;;  %916 = vmatmul.mubr.f32.vlgmr.msra.gmra.mrb[0].mxu0 %v243_v20 }
  0x22   : > { %885 = vmatprep.mubr.f32.mxu1 %v233_v19  ;;  %918 = vmatprep.mubr.f32.mxu0 %v253_v23 }
  0x23   : > { %954 = vmatpush3.bf16.msra.mxu0 %v1022_v4 }
  0x25   : > { %886 = vmatmul.mubr.f32.vlgmr.msra.gmra.mrb[0].mxu1 %v243_v20  ;;  %919 = vmatmul.mubr.f32.gmra.mrb[2].mxu0 %v263_v28 }
  0x26   : > { %942 = vmatpush3.bf16.msra.mxu1 %v939_v42  ;;  %888 = vmatprep.mubr.f32.mxu1 %v253_v23 }
  0x27   : > { %925 = vmatprep.mubr.f32.mxu0 %v233_v19 }
  0x29   : > { %889 = vmatmul.mubr.f32.gmra.mrb[2].mxu1 %v263_v28  ;;  %926 = vmatmul.mubr.f32.vlgmr.msra.gmra.mrb[0].mxu0 %v243_v20 }
  0x2a   : > { %895 = vmatprep.mubr.f32.mxu1 %v234_v25  ;;  %928 = vmatprep.mubr.f32.mxu0 %v253_v23 }
  0x2d   : > { %896 = vmatmul.mubr.f32.vlgmr.msra.gmra.mrb[0].mxu1 %v244_v26  ;;  %929 = vmatmul.mubr.f32.gmra.mrb[2].mxu0 %v263_v28 }
  0x2e   : > { %898 = vmatprep.mubr.f32.mxu1 %v254_v29 }
  0x31   : > { %899 = vmatmul.mubr.f32.gmra.mrb[2].mxu1 %v264_v32 }
  0xfc   : > { %v927_v44 = vpop.f32.mrb[0].mxu0 }
  0xfd   : > { %v732_v45 = vpop.f32.mrb[1].mxu0 }
 0x100   : > { %v897_v46 = vpop.f32.mrb[0].mxu1  ;;  %v930_v47 = vpop.f32.mrb[2].mxu0 }
 0x101   : > { %v955_v48 = vadd.f32 %v927_v44, %v897_v46  ;;  %v444_v49 = vpop.f32.mrb[1].mxu1  ;;  %v744_v50 = vpop.f32.mrb[3].mxu0 }
 0x102   : > { %v956_v51 = vadd.f32 %v732_v45, %v444_v49 }
 0x103   : > { %v755_v52 = vmul.f32 1.5, %v955_v48 }
 0x104   : > { %v754_v53 = vmul.f32 1.5, %v956_v51  ;;  %v900_v54 = vpop.f32.mrb[2].mxu1 }
 0x105   : > { %760 = vst.msk [vmem:[%s145_s22 + $0x8] sm:$0xff] %vm758_vm1, %v755_v52  ;;  %v957_v55 = vadd.f32 %v930_v47, %v900_v54  ;;  %v458_v56 = vpop.f32.mrb[3].mxu1 }
 0x106   : > { %765 = vst.msk [vmem:[%s145_s22 + $0x8] sm:$0xff] %vm763_vm2, %v992_v57  ;;  %v958_v58 = vadd.f32 %v744_v50, %v458_v56 }
 0x107   : > { %759 = vst.msk [vmem:[%s145_s22] sm:$0xff] %vm758_vm1, %v754_v53  ;;  %v757_v59 = vmul.f32 1.5, %v957_v55 }
 0x108   : > { %764 = vst.msk [vmem:[%s145_s22] sm:$0xff] %vm763_vm2, %v992_v57  ;;  %v756_v60 = vmul.f32 1.5, %v958_v58 }
 0x109   : > { %762 = vst.msk [vmem:[%s145_s22 + $0x18] sm:$0xff] %vm758_vm1, %v757_v59 }
 0x10a   : > { %767 = vst.msk [vmem:[%s145_s22 + $0x18] sm:$0xff] %vm763_vm2, %v992_v57 }
 0x10b   : > { %761 = vst.msk [vmem:[%s145_s22 + $0x10] sm:$0xff] %vm758_vm1, %v756_v60 }
 0x10c   : > { %766 = vst.msk [vmem:[%s145_s22 + $0x10] sm:$0xff] %vm763_vm2, %v992_v57 }
 0x10d PF: > { %s12_s9 = sadd.s32 1, %s990_s9  }
 0x10e   : > { %p9_p4 = scmp.ge.s32.totalorder %s12_s9, 6  }
 0x110   :  { %11 = sbr.rel (!%p9_p4) target bundleno = 1 (0x1), region = 58 }

</bundles_post_ra>
